<compile_context>
chip_gen: v7x
topology: tpu7x:2x2x1
jax: 0.10.0
libtpu: 0.0.40
codegen_flags: <defaults>
</compile_context>

<pallas_src>
import math
import numpy as np

import jax
import jax.numpy as jnp
from jax.experimental import pallas as pl
from jax.experimental.pallas import tpu as pltpu

KERNLEN = 21
NSIG = 3
PAD = (KERNLEN - 1) // 2  # 10


def gauss_kernel(kernlen=21, nsig=3, channels=1):
    """Same math as the PyTorch reference (scipy.stats.norm.cdf via erf)."""
    interval = (2 * nsig + 1.0) / kernlen
    x = np.linspace(-nsig - interval / 2.0, nsig + interval / 2.0, kernlen + 1)
    cdf = np.array([0.5 * (1.0 + math.erf(v / math.sqrt(2.0))) for v in x])
    kern1d = np.diff(cdf)
    kernel_raw = np.sqrt(np.outer(kern1d, kern1d))
    kernel = kernel_raw / kernel_raw.sum()
    out_filter = np.array(kernel, dtype=np.float32)
    out_filter = out_filter.reshape((kernlen, kernlen, 1, 1))
    out_filter = np.repeat(out_filter, channels, axis=2)
    return out_filter  # (21, 21, C, 1)


def gauss_1d(kernlen=21, nsig=3):
    """1-D factor g with outer(g, g) == the normalized 2-D Blur kernel."""
    interval = (2 * nsig + 1.0) / kernlen
    x = np.linspace(-nsig - interval / 2.0, nsig + interval / 2.0, kernlen + 1)
    cdf = np.array([0.5 * (1.0 + math.erf(v / math.sqrt(2.0))) for v in x])
    kern1d = np.diff(cdf)
    s = np.sqrt(kern1d)                     # kernel_raw = outer(s, s)
    return s / s.sum()                      # float64; outer(g,g) == kernel


def _band_matrix(n_out, n_in, g, pad):
    """M[i, k] = g[k - i + pad] inside the band, else 0.

    Encodes one 1-D blur pass *including* the zero padding (pad=10), so no
    padded activation is ever materialized in HBM."""
    m = np.zeros((n_out, n_in), dtype=np.float64)
    taps = len(g)
    for i in range(n_out):
        lo = max(0, i - pad)
        hi = min(n_in, i - pad + taps)
        for k in range(lo, hi):
            m[i, k] = g[k - i + pad]
    return m.astype(np.float32)


def _blur_kernel(a_ref, b_ref, x_ref, o_ref):
    # a_ref: VMEM (H, H)     row-pass banded Toeplitz (padding folded in)
    # b_ref: VMEM (W, W)     column-pass banded Toeplitz (padding folded in)
    # x_ref: VMEM (KB, H, W) block of KB image planes
    # o_ref: VMEM (KB, H, W) blurred output planes
    kb, h, w = x_ref.shape
    hp = jax.lax.Precision.HIGHEST  # exact-f32 MXU passes (1e-4 tolerance)

    # Column (W-direction) pass for all KB planes as one MXU matmul.
    x2d = x_ref[...].astype(jnp.float32).reshape(kb * h, w)
    t = jnp.dot(x2d, b_ref[...],
                preferred_element_type=jnp.float32, precision=hp)
    t = t.reshape(kb, h, w)

    # Row (H-direction) pass: one MXU matmul per plane (KB small & static).
    a = a_ref[...]
    for p in range(kb):
        o_ref[p] = jnp.dot(a, t[p],
                           preferred_element_type=jnp.float32,
                           precision=hp).astype(o_ref.dtype)


def _planes_per_block(num_planes, h, w, max_block_bytes=2 << 20):
    # ~2 MiB input block => <= ~12 MiB total VMEM (double-buffered in/out +
    # f32 temp + tiny Toeplitz constants); fits default scoped VMEM on
    # v5e / v6e / v7x.  Bump max_block_bytes per generation if desired.
    plane_bytes = h * w * 4
    kb = max(1, min(num_planes, max_block_bytes // max(plane_bytes, 1)))
    while num_planes % kb:
        kb -= 1
    return kb


def blur_forward(x, nc):
    """Depthwise 21x21 Gaussian blur, stride=1, padding=10 (== Blur.forward)."""
    n, c, h, w = x.shape
    if c != nc:
        raise RuntimeError(
            'The channel of input [%d] does not match the preset channel [%d]'
            % (c, nc))

    # Blur's weight is the same deterministic separable Gaussian for every
    # channel, so the depthwise conv is out[n,c] = A @ x[n,c] @ B.
    g = gauss_1d(KERNLEN, NSIG)
    a_mat = jnp.asarray(_band_matrix(h, h, g, PAD))      # (H, H): A[i,k]=g[k-i+10]
    b_mat = jnp.asarray(_band_matrix(w, w, g, PAD).T)    # (W, W): B[m,j]=g[m-j+10]

    num_planes = n * c
    x_planes = x.reshape(num_planes, h, w)               # free reshape
    kb = _planes_per_block(num_planes, h, w)

    out = pl.pallas_call(
        _blur_kernel,
        out_shape=jax.ShapeDtypeStruct((num_planes, h, w), x.dtype),
        grid=(num_planes // kb,),
        in_specs=[
            pl.BlockSpec((h, h), lambda i: (0, 0)),
            pl.BlockSpec((w, w), lambda i: (0, 0)),
            pl.BlockSpec((kb, h, w), lambda i: (i, 0, 0)),
        ],
        out_specs=pl.BlockSpec((kb, h, w), lambda i: (i, 0, 0)),
        compiler_params=pltpu.CompilerParams(
            dimension_semantics=("parallel",),
            vmem_limit_bytes=32 * 1024 * 1024),
    )(a_mat, b_mat, x_planes)

    return out.reshape(n, c, h, w)


if __name__ == "__main__":
    N, C, H, W = 2, 4, 16, 16

    # Deterministic parameter init, exactly as Blur.__init__ does:
    # gauss_kernel -> permute(2, 3, 0, 1) -> (C, 1, 21, 21) depthwise weight.
    w_np = gauss_kernel(kernlen=KERNLEN, nsig=NSIG, channels=C)
    weight = jnp.asarray(np.transpose(w_np, (2, 3, 0, 1)))  # (C, 1, 21, 21)

    key = jax.random.PRNGKey(0)
    x = jax.random.normal(key, (N, C, H, W), dtype=jnp.float32)

    out = blur_forward(x, nc=C)
    out = jax.block_until_ready(out)

    # Reference: grouped (depthwise) conv via XLA, same semantics as F.conv2d.
    ref = jax.lax.conv_general_dilated(
        x, weight, window_strides=(1, 1),
        padding=((PAD, PAD), (PAD, PAD)),
        dimension_numbers=("NCHW", "OIHW", "NCHW"),
        feature_group_count=C,
        precision=jax.lax.Precision.HIGHEST)

    assert out.shape == (N, C, H, W)
    assert jnp.allclose(out, ref, atol=1e-4, rtol=1e-4)
    print("KERNEL_OK")
</pallas_src>

<mosaic_0001>
module attributes {stable_mosaic.version = 11 : i64} {
  func.func @_blur_kernel(%arg0: i32, %arg1: memref<16x16xf32, #tpu.memory_space<vmem>>, %arg2: memref<16x16xf32, #tpu.memory_space<vmem>>, %arg3: memref<8x16x16xf32, #tpu.memory_space<vmem>>, %arg4: memref<8x16x16xf32, #tpu.memory_space<vmem>>) attributes {dimension_semantics = [#tpu.dimension_semantics<parallel>], iteration_bounds = array<i64: 1>, scalar_prefetch = 0 : i64, scratch_operands = 0 : i64, tpu.core_type = #tpu.core_type<tc>, window_params = [{pipeline_mode = #tpu.pipeline_mode<synchronous>, transform_indices = @transform_0, window_bounds = array<i64: 16, 16>}, {pipeline_mode = #tpu.pipeline_mode<synchronous>, transform_indices = @transform_1, window_bounds = array<i64: 16, 16>}, {transform_indices = @transform_2, window_bounds = array<i64: 8, 16, 16>}, {transform_indices = @transform_3, window_bounds = array<i64: 8, 16, 16>}]} {
    %c0 = arith.constant 0 : index
    %c0_0 = arith.constant 0 : index
    %c0_1 = arith.constant 0 : index
    %0 = vector.load %arg3[%c0, %c0_0, %c0_1] : memref<8x16x16xf32, #tpu.memory_space<vmem>>, vector<8x16x16xf32>
    %1 = vector.shape_cast %0 : vector<8x16x16xf32> to vector<128x16xf32>
    %c0_2 = arith.constant 0 : index
    %c0_3 = arith.constant 0 : index
    %2 = vector.load %arg2[%c0_2, %c0_3] : memref<16x16xf32, #tpu.memory_space<vmem>>, vector<16x16xf32>
    %cst = arith.constant dense<0.000000e+00> : vector<128x16xf32>
    %3 = tpu.matmul %1, %2, %cst {dimension_numbers = #tpu.dot_dimension_numbers<[1], [0], [0], [1], [0, 0, 1, 1], [], []>, precision = #tpu.contract_precision<fp32>} : vector<128x16xf32>, vector<16x16xf32>, vector<128x16xf32> -> vector<128x16xf32>
    %4 = vector.shape_cast %3 : vector<128x16xf32> to vector<8x16x16xf32>
    %c0_4 = arith.constant 0 : index
    %c0_5 = arith.constant 0 : index
    %5 = vector.load %arg1[%c0_4, %c0_5] : memref<16x16xf32, #tpu.memory_space<vmem>>, vector<16x16xf32>
    %6 = vector.extract_strided_slice %4 {offsets = [0, 0, 0], sizes = [1, 16, 16], strides = [1, 1, 1]} : vector<8x16x16xf32> to vector<1x16x16xf32>
    %7 = vector.shape_cast %6 : vector<1x16x16xf32> to vector<16x16xf32>
    %cst_6 = arith.constant dense<0.000000e+00> : vector<16x16xf32>
    %8 = tpu.matmul %5, %7, %cst_6 {dimension_numbers = #tpu.dot_dimension_numbers<[1], [0], [0], [1], [0, 0, 1, 1], [], []>, precision = #tpu.contract_precision<fp32>} : vector<16x16xf32>, vector<16x16xf32>, vector<16x16xf32> -> vector<16x16xf32>
    %c0_7 = arith.constant 0 : index
    %c0_8 = arith.constant 0 : index
    %c0_9 = arith.constant 0 : index
    %9 = vector.load %arg4[%c0_7, %c0_8, %c0_9] : memref<8x16x16xf32, #tpu.memory_space<vmem>>, vector<1x16x16xf32>
    %10 = vector.shape_cast %9 : vector<1x16x16xf32> to vector<16x16xf32>
    %11 = vector.shape_cast %8 : vector<16x16xf32> to vector<1x16x16xf32>
    tpu.vector_store %arg4[%c0_7, %c0_8, %c0_9], %11 {strides = array<i32>} : memref<8x16x16xf32, #tpu.memory_space<vmem>>, vector<1x16x16xf32>,
    %12 = vector.extract_strided_slice %4 {offsets = [1, 0, 0], sizes = [1, 16, 16], strides = [1, 1, 1]} : vector<8x16x16xf32> to vector<1x16x16xf32>
    %13 = vector.shape_cast %12 : vector<1x16x16xf32> to vector<16x16xf32>
    %cst_10 = arith.constant dense<0.000000e+00> : vector<16x16xf32>
    %14 = tpu.matmul %5, %13, %cst_10 {dimension_numbers = #tpu.dot_dimension_numbers<[1], [0], [0], [1], [0, 0, 1, 1], [], []>, precision = #tpu.contract_precision<fp32>} : vector<16x16xf32>, vector<16x16xf32>, vector<16x16xf32> -> vector<16x16xf32>
    %c1 = arith.constant 1 : index
    %c0_11 = arith.constant 0 : index
    %c0_12 = arith.constant 0 : index
    %15 = vector.load %arg4[%c1, %c0_11, %c0_12] : memref<8x16x16xf32, #tpu.memory_space<vmem>>, vector<1x16x16xf32>
    %16 = vector.shape_cast %15 : vector<1x16x16xf32> to vector<16x16xf32>
    %17 = vector.shape_cast %14 : vector<16x16xf32> to vector<1x16x16xf32>
    tpu.vector_store %arg4[%c1, %c0_11, %c0_12], %17 {strides = array<i32>} : memref<8x16x16xf32, #tpu.memory_space<vmem>>, vector<1x16x16xf32>,
    %18 = vector.extract_strided_slice %4 {offsets = [2, 0, 0], sizes = [1, 16, 16], strides = [1, 1, 1]} : vector<8x16x16xf32> to vector<1x16x16xf32>
    %19 = vector.shape_cast %18 : vector<1x16x16xf32> to vector<16x16xf32>
    %cst_13 = arith.constant dense<0.000000e+00> : vector<16x16xf32>
    %20 = tpu.matmul %5, %19, %cst_13 {dimension_numbers = #tpu.dot_dimension_numbers<[1], [0], [0], [1], [0, 0, 1, 1], [], []>, precision = #tpu.contract_precision<fp32>} : vector<16x16xf32>, vector<16x16xf32>, vector<16x16xf32> -> vector<16x16xf32>
    %c2 = arith.constant 2 : index
    %c0_14 = arith.constant 0 : index
    %c0_15 = arith.constant 0 : index
    %21 = vector.load %arg4[%c2, %c0_14, %c0_15] : memref<8x16x16xf32, #tpu.memory_space<vmem>>, vector<1x16x16xf32>
    %22 = vector.shape_cast %21 : vector<1x16x16xf32> to vector<16x16xf32>
    %23 = vector.shape_cast %20 : vector<16x16xf32> to vector<1x16x16xf32>
    tpu.vector_store %arg4[%c2, %c0_14, %c0_15], %23 {strides = array<i32>} : memref<8x16x16xf32, #tpu.memory_space<vmem>>, vector<1x16x16xf32>,
    %24 = vector.extract_strided_slice %4 {offsets = [3, 0, 0], sizes = [1, 16, 16], strides = [1, 1, 1]} : vector<8x16x16xf32> to vector<1x16x16xf32>
    %25 = vector.shape_cast %24 : vector<1x16x16xf32> to vector<16x16xf32>
    %cst_16 = arith.constant dense<0.000000e+00> : vector<16x16xf32>
    %26 = tpu.matmul %5, %25, %cst_16 {dimension_numbers = #tpu.dot_dimension_numbers<[1], [0], [0], [1], [0, 0, 1, 1], [], []>, precision = #tpu.contract_precision<fp32>} : vector<16x16xf32>, vector<16x16xf32>, vector<16x16xf32> -> vector<16x16xf32>
    %c3 = arith.constant 3 : index
    %c0_17 = arith.constant 0 : index
    %c0_18 = arith.constant 0 : index
    %27 = vector.load %arg4[%c3, %c0_17, %c0_18] : memref<8x16x16xf32, #tpu.memory_space<vmem>>, vector<1x16x16xf32>
    %28 = vector.shape_cast %27 : vector<1x16x16xf32> to vector<16x16xf32>
    %29 = vector.shape_cast %26 : vector<16x16xf32> to vector<1x16x16xf32>
    tpu.vector_store %arg4[%c3, %c0_17, %c0_18], %29 {strides = array<i32>} : memref<8x16x16xf32, #tpu.memory_space<vmem>>, vector<1x16x16xf32>,
    %30 = vector.extract_strided_slice %4 {offsets = [4, 0, 0], sizes = [1, 16, 16], strides = [1, 1, 1]} : vector<8x16x16xf32> to vector<1x16x16xf32>
    %31 = vector.shape_cast %30 : vector<1x16x16xf32> to vector<16x16xf32>
    %cst_19 = arith.constant dense<0.000000e+00> : vector<16x16xf32>
    %32 = tpu.matmul %5, %31, %cst_19 {dimension_numbers = #tpu.dot_dimension_numbers<[1], [0], [0], [1], [0, 0, 1, 1], [], []>, precision = #tpu.contract_precision<fp32>} : vector<16x16xf32>, vector<16x16xf32>, vector<16x16xf32> -> vector<16x16xf32>
    %c4 = arith.constant 4 : index
    %c0_20 = arith.constant 0 : index
    %c0_21 = arith.constant 0 : index
    %33 = vector.load %arg4[%c4, %c0_20, %c0_21] : memref<8x16x16xf32, #tpu.memory_space<vmem>>, vector<1x16x16xf32>
    %34 = vector.shape_cast %33 : vector<1x16x16xf32> to vector<16x16xf32>
    %35 = vector.shape_cast %32 : vector<16x16xf32> to vector<1x16x16xf32>
    tpu.vector_store %arg4[%c4, %c0_20, %c0_21], %35 {strides = array<i32>} : memref<8x16x16xf32, #tpu.memory_space<vmem>>, vector<1x16x16xf32>,
    %36 = vector.extract_strided_slice %4 {offsets = [5, 0, 0], sizes = [1, 16, 16], strides = [1, 1, 1]} : vector<8x16x16xf32> to vector<1x16x16xf32>
    %37 = vector.shape_cast %36 : vector<1x16x16xf32> to vector<16x16xf32>
    %cst_22 = arith.constant dense<0.000000e+00> : vector<16x16xf32>
    %38 = tpu.matmul %5, %37, %cst_22 {dimension_numbers = #tpu.dot_dimension_numbers<[1], [0], [0], [1], [0, 0, 1, 1], [], []>, precision = #tpu.contract_precision<fp32>} : vector<16x16xf32>, vector<16x16xf32>, vector<16x16xf32> -> vector<16x16xf32>
    %c5 = arith.constant 5 : index
    %c0_23 = arith.constant 0 : index
    %c0_24 = arith.constant 0 : index
    %39 = vector.load %arg4[%c5, %c0_23, %c0_24] : memref<8x16x16xf32, #tpu.memory_space<vmem>>, vector<1x16x16xf32>
    %40 = vector.shape_cast %39 : vector<1x16x16xf32> to vector<16x16xf32>
    %41 = vector.shape_cast %38 : vector<16x16xf32> to vector<1x16x16xf32>
    tpu.vector_store %arg4[%c5, %c0_23, %c0_24], %41 {strides = array<i32>} : memref<8x16x16xf32, #tpu.memory_space<vmem>>, vector<1x16x16xf32>,
    %42 = vector.extract_strided_slice %4 {offsets = [6, 0, 0], sizes = [1, 16, 16], strides = [1, 1, 1]} : vector<8x16x16xf32> to vector<1x16x16xf32>
    %43 = vector.shape_cast %42 : vector<1x16x16xf32> to vector<16x16xf32>
    %cst_25 = arith.constant dense<0.000000e+00> : vector<16x16xf32>
    %44 = tpu.matmul %5, %43, %cst_25 {dimension_numbers = #tpu.dot_dimension_numbers<[1], [0], [0], [1], [0, 0, 1, 1], [], []>, precision = #tpu.contract_precision<fp32>} : vector<16x16xf32>, vector<16x16xf32>, vector<16x16xf32> -> vector<16x16xf32>
    %c6 = arith.constant 6 : index
    %c0_26 = arith.constant 0 : index
    %c0_27 = arith.constant 0 : index
    %45 = vector.load %arg4[%c6, %c0_26, %c0_27] : memref<8x16x16xf32, #tpu.memory_space<vmem>>, vector<1x16x16xf32>
    %46 = vector.shape_cast %45 : vector<1x16x16xf32> to vector<16x16xf32>
    %47 = vector.shape_cast %44 : vector<16x16xf32> to vector<1x16x16xf32>
    tpu.vector_store %arg4[%c6, %c0_26, %c0_27], %47 {strides = array<i32>} : memref<8x16x16xf32, #tpu.memory_space<vmem>>, vector<1x16x16xf32>,
    %48 = vector.extract_strided_slice %4 {offsets = [7, 0, 0], sizes = [1, 16, 16], strides = [1, 1, 1]} : vector<8x16x16xf32> to vector<1x16x16xf32>
    %49 = vector.shape_cast %48 : vector<1x16x16xf32> to vector<16x16xf32>
    %cst_28 = arith.constant dense<0.000000e+00> : vector<16x16xf32>
    %50 = tpu.matmul %5, %49, %cst_28 {dimension_numbers = #tpu.dot_dimension_numbers<[1], [0], [0], [1], [0, 0, 1, 1], [], []>, precision = #tpu.contract_precision<fp32>} : vector<16x16xf32>, vector<16x16xf32>, vector<16x16xf32> -> vector<16x16xf32>
    %c7 = arith.constant 7 : index
    %c0_29 = arith.constant 0 : index
    %c0_30 = arith.constant 0 : index
    %51 = vector.load %arg4[%c7, %c0_29, %c0_30] : memref<8x16x16xf32, #tpu.memory_space<vmem>>, vector<1x16x16xf32>
    %52 = vector.shape_cast %51 : vector<1x16x16xf32> to vector<16x16xf32>
    %53 = vector.shape_cast %50 : vector<16x16xf32> to vector<1x16x16xf32>
    tpu.vector_store %arg4[%c7, %c0_29, %c0_30], %53 {strides = array<i32>} : memref<8x16x16xf32, #tpu.memory_space<vmem>>, vector<1x16x16xf32>,
    return
  }
  func.func @transform_0(%arg0: i32) -> (i32, i32) {
    %c0_i32 = arith.constant 0 : i32
    %c0_i32_0 = arith.constant 0 : i32
    %c0_i32_1 = arith.constant 0 : i32
    return %c0_i32, %c0_i32_0 : i32, i32
  }
  func.func @transform_1(%arg0: i32) -> (i32, i32) {
    %c0_i32 = arith.constant 0 : i32
    %c0_i32_0 = arith.constant 0 : i32
    %c0_i32_1 = arith.constant 0 : i32
    return %c0_i32, %c0_i32_0 : i32, i32
  }
  func.func @transform_2(%arg0: i32) -> (i32, i32, i32) {
    %c0_i32 = arith.constant 0 : i32
    %c0_i32_0 = arith.constant 0 : i32
    %c0_i32_1 = arith.constant 0 : i32
    return %arg0, %c0_i32, %c0_i32_0 : i32, i32, i32
  }
  func.func @transform_3(%arg0: i32) -> (i32, i32, i32) {
    %c0_i32 = arith.constant 0 : i32
    %c0_i32_0 = arith.constant 0 : i32
    %c0_i32_1 = arith.constant 0 : i32
    return %arg0, %c0_i32, %c0_i32_0 : i32, i32, i32
  }
}

</mosaic_0001>

<bundles_post_ra>
// kernel: tpu_custom_call.1
= control target key start
LH: loop header
LB: loop body
LE: loop exit
PB: predicated region body
PF: predicated region fallthrough
CT: control target
= control target key end

     0   :  { %8 = vsyncpa [#allocation3], 0  ;;  %s7237_s0 = inlined_call_operand.hbm [shape: f32[16,16], index: 0, kind: input, shape index: {}]   ;;  %s7238_s1 = inlined_call_operand.hbm [shape: f32[16,16], index: 1, kind: input, shape index: {}]   ;;  %s7239_s2 = inlined_call_operand.hbm [shape: f32[8,16,16], index: 2, kind: input, shape index: {}]   ;;  %s7240_s3 = inlined_call_operand.hbm [shape: f32[8,16,16], index: 3, kind: output, shape index: {}]  }
   0x1   :  { %9 = vsyncpa [#allocation6], 0 }
   0x2   :  { %10 = vsyncpa [#allocation4], 0  ;;  %s6572_s12 = smov [#allocation5]   ;;  %s6573_s14 = smov [#allocation2]  }
   0x3   :  { %s28_s13 = sshll.u32 %s6572_s12, 4  ;;  %s16_s15 = sshll.u32 %s6573_s14, 4  ;;  %s29_s13 = int_to_ptr.vmem [resolvable:$true] %s28_s13  ;;  %s6598_s15 = int_to_ptr.vmem [resolvable:$true] %s16_s15 }
   0x4   :  { %s6478_s18 = scalar_lea.hbm %s7238_s1, 256 }
   0x5   :  { %p6479_p0 = scmp.ne.s32.totalorder %s7238_s1, %s6478_s18  ;;  %p6482_p1 = scmp.lt.u32.totalorder %s6478_s18, %s7238_s1 }
   0x7   :  { %p6484_p2 = pnand %p6482_p1, %p6479_p0 }
   0x9   :  { %6487 = shalt.err (!%p6484_p2)
}
   0xa   :  { %s6488_s23 = scalar_lea.vmem %s29_s13, 256  ;;  %p6493_p4 = scmp.lt.s32.totalorder %s29_s13, %s29_s13 }
   0xb   :  { %p6489_p3 = scmp.ne.s32.totalorder %s29_s13, %s6488_s23  ;;  %p6494_p5 = scmp.lt.s32.totalorder %s6488_s23, %s6488_s23 }
   0xd   :  { %p6495_p6 = por %p6494_p5, %p6493_p4 }
   0xf   :  { %p6496_p7 = pnand %p6495_p6, %p6489_p3 }
  0x11   :  { %6499 = shalt.err (!%p6496_p7)
}
  0x12   :  { %s6574_s24 = smov 128   ;;  %s6575_s25 = smov 8  }
  0x13   :  { %34 = dma.hbm_to_vmem [thread:$0]  %s7238_s1, 256, %s29_s13, [#allocation6], %s6574_s24, %s6574_s24, %s6575_s25  }
  0x14   :  { %s6500_s30 = scalar_lea.hbm %s7237_s0, 256 }
  0x15   :  { %p6501_p8 = scmp.ne.s32.totalorder %s7237_s0, %s6500_s30  ;;  %p6504_p9 = scmp.lt.u32.totalorder %s6500_s30, %s7237_s0 }
  0x17   :  { %p6506_p10 = pnand %p6504_p9, %p6501_p8 }
  0x19   :  { %6509 = shalt.err (!%p6506_p10)
}
  0x1a   :  { %s6510_s8 = scalar_lea.vmem %s6598_s15, 256  ;;  %p6515_p12 = scmp.lt.s32.totalorder %s6598_s15, %s6598_s15 }
  0x1b   :  { %p6511_p11 = scmp.ne.s32.totalorder %s6598_s15, %s6510_s8  ;;  %p6516_p13 = scmp.lt.s32.totalorder %s6510_s8, %s6510_s8 }
  0x1d   :  { %p6517_p0 = por %p6516_p13, %p6515_p12 }
  0x1f   :  { %p6518_p1 = pnand %p6517_p0, %p6511_p11 }
  0x21   :  { %6521 = shalt.err (!%p6518_p1)
}
  0x22   :  { %22 = dma.hbm_to_vmem [thread:$0]  %s7237_s0, 256, %s6598_s15, [#allocation3], %s6574_s24, %s6574_s24, %s6575_s25  }
  0x23   :  { %s6576_s10 = smov [#allocation7]   ;;  %s6522_s14 = scalar_lea.hbm %s7239_s2, 2048 }
  0x24   :  { %s40_s11 = sshll.u32 %s6576_s10, 4  ;;  %p6523_p2 = scmp.ne.s32.totalorder %s7239_s2, %s6522_s14  ;;  %s41_s11 = int_to_ptr.vmem [resolvable:$true] %s40_s11 }
  0x25   :  { %p6526_p3 = scmp.lt.u32.totalorder %s6522_s14, %s7239_s2 }
  0x27   :  { %p6528_p4 = pnand %p6526_p3, %p6523_p2 }
  0x29   :  { %6531 = shalt.err (!%p6528_p4)
}
  0x2a   :  { %s6532_s20 = scalar_lea.vmem %s41_s11, 2048  ;;  %p6537_p6 = scmp.lt.s32.totalorder %s41_s11, %s41_s11 }
  0x2b   :  { %p6533_p5 = scmp.ne.s32.totalorder %s41_s11, %s6532_s20  ;;  %p6538_p7 = scmp.lt.s32.totalorder %s6532_s20, %s6532_s20 }
  0x2d   :  { %p6539_p8 = por %p6538_p7, %p6537_p6 }
  0x2f   :  { %p6540_p9 = pnand %p6539_p8, %p6533_p5 }
  0x31   :  { %6543 = shalt.err (!%p6540_p9)
}
  0x32   :  { %46 = dma.hbm_to_vmem [thread:$0]  %s7239_s2, 2048, %s41_s11, [#allocation6], %s6574_s24, %s6574_s24, %s6575_s25  }
  0x33   :  { %6566 = dma.done.wait [#allocation3], 256  }
  0x34   :  { %6567 = vsyncadd [#allocation3], 4294967040 }
  0x35   :  { %6568 = dma.done.wait [#allocation6], 2304  }
  0x36   :  { %6569 = vsyncadd [#allocation6], 4294964992  ;;  %vm74_vm0 = vcmask 130048   ;;  %v72_v0 = vld [vmem:[#allocation5] sm:$0xff]  ;;  %v73_v1 = vld [vmem:[#allocation5 + $0x8] sm:$0xff]  ;;  %s6577_s2 = smov [#allocation8]  }
  0x37   :  { %v56_v2 = vld [vmem:[#allocation7] sm:$0xff]  ;;  %v124_v3 = vand.u32 4294901760, %v72_v0  ;;  %v127_v4 = vand.u32 4294901760, %v73_v1  ;;  %v57_v6 = vld [vmem:[#allocation7 + $0x8] sm:$0xff]  ;;  %v58_v7 = vld [vmem:[#allocation7 + $0x10] sm:$0xff]  ;;  %s5279_s21 = sshll.u32 %s6577_s2, 4  ;;  %s5280_s21 = int_to_ptr.vmem [resolvable:$true] %s5279_s21 }
  0x38   :  { %v76_v5 = vsel %vm74_vm0, %v56_v2, 0  ;;  %v59_v8 = vld [vmem:[#allocation7 + $0x18] sm:$0xff]  ;;  %v79_v10 = vsel %vm74_vm0, %v57_v6, 0  ;;  %v82_v11 = vsel %vm74_vm0, %v58_v7, 0  ;;  %v60_v13 = vld [vmem:[#allocation7 + $0x20] sm:$0xff]  ;;  %v61_v18 = vld [vmem:[#allocation7 + $0x28] sm:$0xff]  ;;  %p6549_p11 = scmp.lt.s32.totalorder %s5280_s21, %s5280_s21 }
  0x39   :  { %v6651_v9 = vand.u32 4294901760, %v76_v5  ;;  %v85_v12 = vsel %vm74_vm0, %v59_v8, 0  ;;  %v6656_v14 = vpack.c.bf16 %v127_v4, %v124_v3  ;;  %v6658_v15 = vand.u32 4294901760, %v79_v10  ;;  %v62_v43 = vld [vmem:[#allocation7 + $0x30] sm:$0xff]  ;;  %v63_v44 = vld [vmem:[#allocation7 + $0x38] sm:$0xff]  ;;  %v64_v49 = vld [vmem:[#allocation7 + $0x40] sm:$0xff] }
  0x3a   :  { %v6660_v16 = vand.u32 4294901760, %v82_v11  ;;  %v6662_v17 = vand.u32 4294901760, %v85_v12  ;;  %v6667_v20 = vsub.f32 %v72_v0, %v124_v3  ;;  %v6669_v21 = vsub.f32 %v73_v1, %v127_v4  ;;  %v65_v54 = vld [vmem:[#allocation7 + $0x48] sm:$0xff]  ;;  %v66_v55 = vld [vmem:[#allocation7 + $0x50] sm:$0xff]  ;;  %v67_v0 = vld [vmem:[#allocation7 + $0x58] sm:$0xff]  ;;  %s6544_s22 = scalar_lea.vmem %s5280_s21, 2048 }
  0x3b   :  { %v6665_v19 = vsub.f32 %v76_v5, %v6651_v9  ;;  %v88_v22 = vsel %vm74_vm0, %v60_v13, 0  ;;  %6097 = vmatprep.subr.bf16.mxu0 %v6656_v14  ;;  %v6674_v23 = vsub.f32 %v79_v10, %v6658_v15  ;;  %v91_v30 = vsel %vm74_vm0, %v61_v18, 0  ;;  %v68_v1 = vld [vmem:[#allocation7 + $0x60] sm:$0xff]  ;;  %p6545_p10 = scmp.ne.s32.totalorder %s5280_s21, %s6544_s22  ;;  %p6550_p12 = scmp.lt.s32.totalorder %s6544_s22, %s6544_s22 }
  0x3c   :  { %v6677_v24 = vsub.f32 %v82_v11, %v6660_v16  ;;  %v6680_v25 = vsub.f32 %v85_v12, %v6662_v17  ;;  %v6682_v26 = vand.u32 4294901760, %v88_v22  ;;  %6099 = vmatpush3.bf16.msra.mxu0 %v6656_v14  ;;  %v353_v28 = vand.u32 4294901760, %v6667_v20  ;;  %v69_v11 = vld [vmem:[#allocation7 + $0x68] sm:$0xff] }
  0x3d   :  { %v192_v27 = vand.u32 4294901760, %v6665_v19  ;;  %v360_v29 = vand.u32 4294901760, %v6669_v21  ;;  %v202_v31 = vand.u32 4294901760, %v6674_v23  ;;  %v6704_v38 = vand.u32 4294901760, %v91_v30  ;;  %p6551_p13 = por %p6550_p12, %p6549_p11 }
  0x3e   :  { %v212_v32 = vand.u32 4294901760, %v6677_v24  ;;  %v222_v33 = vand.u32 4294901760, %v6680_v25  ;;  %v6693_v34 = vsub.f32 %v88_v22, %v6682_v26  ;;  %v354_v36 = vsub.f32 %v6667_v20, %v353_v28 }
  0x3f   :  { %v193_v35 = vsub.f32 %v6665_v19, %v192_v27  ;;  %v361_v37 = vsub.f32 %v6669_v21, %v360_v29  ;;  %v203_v39 = vsub.f32 %v6674_v23, %v202_v31  ;;  %v6717_v48 = vsub.f32 %v91_v30, %v6704_v38  ;;  %p6552_p0 = pnand %p6551_p13, %p6545_p10 }
  0x40   :  { %v213_v40 = vsub.f32 %v6677_v24, %v212_v32  ;;  %v223_v41 = vsub.f32 %v6680_v25, %v222_v33  ;;  %v232_v42 = vand.u32 4294901760, %v6693_v34  ;;  %v355_v46 = vand.u32 4294901760, %v354_v36 }
  0x41   :  { %v194_v45 = vand.u32 4294901760, %v193_v35  ;;  %v362_v47 = vand.u32 4294901760, %v361_v37  ;;  %v204_v50 = vand.u32 4294901760, %v203_v39  ;;  %v242_v57 = vand.u32 4294901760, %v6717_v48 }
  0x42   :  { %v214_v51 = vand.u32 4294901760, %v213_v40  ;;  %v224_v52 = vand.u32 4294901760, %v223_v41  ;;  %v233_v53 = vsub.f32 %v6693_v34, %v232_v42  ;;  %v94_v58 = vsel %vm74_vm0, %v62_v43, 0 }
  0x43   :  { %5596 = vmatprep.mubr.f32.mxu0 %v194_v45  ;;  %v6100_v56 = vpack.c.bf16 %v362_v47, %v355_v46  ;;  %v97_v59 = vsel %vm74_vm0, %v63_v44, 0  ;;  %v6725_v61 = vand.u32 4294901760, %v94_v58  ;;  %v100_v63 = vsel %vm74_vm0, %v64_v49, 0 }
  0x44   :  { %5597 = vmatmul.mubr.f32.vlgmr.msra.gmra.mrb[0].mxu0 %v204_v50  ;;  %v234_v60 = vand.u32 4294901760, %v233_v53  ;;  %v6727_v62 = vand.u32 4294901760, %v97_v59  ;;  %v243_v2 = vsub.f32 %v6717_v48, %v242_v57  ;;  %v6733_v3 = vand.u32 4294901760, %v100_v63  ;;  %v70_v53 = vld [vmem:[#allocation7 + $0x70] sm:$0xff] }
  0x45   :  { %5599 = vmatprep.mubr.f32.mxu0 %v214_v51  ;;  %6101 = vmatprep.subr.bf16.mxu0 %v6100_v56  ;;  %v103_v4 = vsel %vm74_vm0, %v65_v54, 0  ;;  %v106_v5 = vsel %vm74_vm0, %v66_v55, 0  ;;  %v6738_v6 = vsub.f32 %v94_v58, %v6725_v61  ;;  %v109_v18 = vsel %vm74_vm0, %v67_v0, 0  ;;  %v71_v54 = vld [vmem:[#allocation7 + $0x78] sm:$0xff] }
  0x46   :  { %6103 = vmatpush3.bf16.msra.mxu0 %v6100_v56  ;;  %v6741_v7 = vsub.f32 %v97_v59, %v6727_v62  ;;  %v6743_v8 = vand.u32 4294901760, %v103_v4  ;;  %v6745_v10 = vand.u32 4294901760, %v106_v5  ;;  %v244_v12 = vand.u32 4294901760, %v243_v2 }
  0x47   :  { %v6748_v13 = vsub.f32 %v100_v63, %v6733_v3  ;;  %v112_v22 = vsel %vm74_vm0, %v68_v1, 0  ;;  %v252_v30 = vand.u32 4294901760, %v6738_v6  ;;  %v6761_v40 = vand.u32 4294901760, %v109_v18 }
  0x48   :  { %5600 = vmatmul.mubr.f32.gmra.mrb[2].mxu0 %v224_v52  ;;  %v262_v35 = vand.u32 4294901760, %v6741_v7  ;;  %v6755_v36 = vsub.f32 %v103_v4, %v6743_v8  ;;  %v6758_v37 = vsub.f32 %v106_v5, %v6745_v10  ;;  %v6763_v41 = vand.u32 4294901760, %v112_v22 }
  0x49   :  { %5602 = vmatprep.mubr.f32.mxu0 %v234_v60  ;;  %v272_v39 = vand.u32 4294901760, %v6748_v13  ;;  %v115_v43 = vsel %vm74_vm0, %v69_v11, 0  ;;  %v253_v44 = vsub.f32 %v6738_v6, %v252_v30  ;;  %v6778_v50 = vsub.f32 %v109_v18, %v6761_v40 }
  0x4a   :  { %v263_v45 = vsub.f32 %v6741_v7, %v262_v35  ;;  %v282_v46 = vand.u32 4294901760, %v6755_v36  ;;  %v292_v47 = vand.u32 4294901760, %v6758_v37  ;;  %v6781_v51 = vsub.f32 %v112_v22, %v6763_v41 }
  0x4b   :  { %v273_v49 = vsub.f32 %v6748_v13, %v272_v39  ;;  %v6783_v52 = vand.u32 4294901760, %v115_v43  ;;  %v254_v55 = vand.u32 4294901760, %v253_v44  ;;  %v302_v63 = vand.u32 4294901760, %v6778_v50 }
  0x4c   :  { %5603 = vmatmul.mubr.f32.gmra.mrb[4].mxu0 %v244_v12  ;;  %v264_v56 = vand.u32 4294901760, %v263_v45  ;;  %v283_v58 = vsub.f32 %v6755_v36, %v282_v46  ;;  %v293_v59 = vsub.f32 %v6758_v37, %v292_v47  ;;  %v312_v0 = vand.u32 4294901760, %v6781_v51 }
  0x4d   :  { %v274_v60 = vand.u32 4294901760, %v273_v49  ;;  %v6794_v1 = vsub.f32 %v115_v43, %v6783_v52  ;;  %5605 = vmatprep.mubr.f32.mxu0 %v254_v55  ;;  %v118_v2 = vsel %vm74_vm0, %v70_v53, 0  ;;  %v121_v4 = vsel %vm74_vm0, %v71_v54, 0 }
  0x4e   :  { %v284_v5 = vand.u32 4294901760, %v283_v58  ;;  %v303_v11 = vsub.f32 %v6778_v50, %v302_v63  ;;  %v6801_v12 = vand.u32 4294901760, %v118_v2  ;;  %v6804_v22 = vand.u32 4294901760, %v121_v4 }
  0x4f   :  { %v322_v18 = vand.u32 4294901760, %v6794_v1  ;;  %v6104_v43 = vpack.c.bf16 %v6669_v21, %v6667_v20  ;;  %v6112_v44 = vpack.c.bf16 %v360_v29, %v353_v28  ;;  %v294_v45 = vand.u32 4294901760, %v293_v59 }
  0x50   :  { %5606 = vmatmul.mubr.f32.gmra.mrb[6].mxu0 %v264_v56  ;;  %v313_v49 = vsub.f32 %v6781_v51, %v312_v0  ;;  %v6816_v53 = vsub.f32 %v118_v2, %v6801_v12  ;;  %v6819_v54 = vsub.f32 %v121_v4, %v6804_v22  ;;  %v304_v20 = vand.u32 4294901760, %v303_v11 }
  0x51   :  { %5608 = vmatprep.mubr.f32.mxu0 %v274_v60  ;;  %6105 = vmatprep.subr.bf16.mxu0 %v6104_v43  ;;  %v323_v21 = vsub.f32 %v6794_v1, %v322_v18 }
  0x52   :  { %v332_v55 = vand.u32 4294901760, %v6816_v53  ;;  %v342_v28 = vand.u32 4294901760, %v6819_v54  ;;  %v314_v29 = vand.u32 4294901760, %v313_v49 }
  0x53   :  { %v324_v58 = vand.u32 4294901760, %v323_v21 }
  0x54   :  { %5609 = vmatmul.mubr.f32.gmra.mrb[8].mxu0 %v284_v5  ;;  %v333_v56 = vsub.f32 %v6816_v53, %v332_v55  ;;  %v343_v59 = vsub.f32 %v6819_v54, %v342_v28 }
  0x55   :  { %5611 = vmatprep.mubr.f32.mxu0 %v294_v45 }
  0x56   :  { %v334_v60 = vand.u32 4294901760, %v333_v56  ;;  %v344_v2 = vand.u32 4294901760, %v343_v59 }
  0x58   :  { %5612 = vmatmul.mubr.f32.gmra.mrb[10].mxu0 %v304_v20 }
  0x59   :  { %5614 = vmatprep.mubr.f32.mxu0 %v314_v29 }
  0x5c   :  { %5615 = vmatmul.mubr.f32.gmra.mrb[12].mxu0 %v324_v58 }
  0x5d   :  { %5617 = vmatprep.mubr.f32.mxu0 %v334_v60 }
  0x60   :  { %5618 = vmatmul.mubr.f32.gmra.mrb[14].mxu0 %v344_v2 }
  0x61   :  { %5624 = vmatprep.mubr.f32.mxu0 %v6651_v9 }
  0x64   :  { %5625 = vmatmul.mubr.f32.vlgmr.msra.gmra.mrb[0].mxu0 %v6658_v15 }
  0x65   :  { %5627 = vmatprep.mubr.f32.mxu0 %v6660_v16  ;;  %6107 = vmatpush3.bf16.msra.mxu0 %v6104_v43 }
  0x66   :  { %6109 = vmatprep.subr.bf16.mxu0 %v6656_v14 }
  0x68   :  { %5628 = vmatmul.mubr.f32.gmra.mrb[2].mxu0 %v6662_v17 }
  0x69   :  { %5630 = vmatprep.mubr.f32.mxu0 %v6682_v26 }
  0x6c   :  { %5631 = vmatmul.mubr.f32.gmra.mrb[4].mxu0 %v6704_v38 }
  0x6d   :  { %5633 = vmatprep.mubr.f32.mxu0 %v6725_v61 }
  0x70   :  { %5634 = vmatmul.mubr.f32.gmra.mrb[6].mxu0 %v6727_v62 }
  0x71   :  { %5636 = vmatprep.mubr.f32.mxu0 %v6733_v3 }
  0x74   :  { %5637 = vmatmul.mubr.f32.gmra.mrb[8].mxu0 %v6743_v8 }
  0x75   :  { %5639 = vmatprep.mubr.f32.mxu0 %v6745_v10 }
  0x78   :  { %5640 = vmatmul.mubr.f32.gmra.mrb[10].mxu0 %v6761_v40 }
  0x79   :  { %5642 = vmatprep.mubr.f32.mxu0 %v6763_v41 }
  0x7c   :  { %5643 = vmatmul.mubr.f32.gmra.mrb[12].mxu0 %v6783_v52 }
  0x7d   :  { %5645 = vmatprep.mubr.f32.mxu0 %v6801_v12 }
  0x80   :  { %5646 = vmatmul.mubr.f32.gmra.mrb[14].mxu0 %v6804_v22 }
  0x81   :  { %5652 = vmatprep.mubr.f32.mxu0 %v6665_v19 }
  0x84   :  { %5653 = vmatmul.mubr.f32.vlgmr.msra.gmra.mrb[0].mxu0 %v6674_v23 }
  0x85   :  { %5655 = vmatprep.mubr.f32.mxu0 %v6677_v24  ;;  %6111 = vmatpush3.bf16.msra.mxu0 %v6656_v14  ;;  %v1228_v24 = vld [vmem:[#allocation2 + $0x8] sm:$0xff] }
  0x86   :  { %6113 = vmatprep.subr.bf16.mxu0 %v6112_v44 }
  0x88   :  { %5656 = vmatmul.mubr.f32.gmra.mrb[2].mxu0 %v6680_v25  ;;  %v1233_v25 = vsel %vm74_vm0, %v1228_v24, 0 }
  0x89   :  { %5658 = vmatprep.mubr.f32.mxu0 %v6693_v34 }
  0x8c   :  { %5659 = vmatmul.mubr.f32.gmra.mrb[4].mxu0 %v6717_v48 }
  0x8d   :  { %5661 = vmatprep.mubr.f32.mxu0 %v6738_v6 }
  0x90   :  { %5662 = vmatmul.mubr.f32.gmra.mrb[6].mxu0 %v6741_v7 }
  0x91   :  { %5664 = vmatprep.mubr.f32.mxu0 %v6748_v13 }
  0x94   :  { %5665 = vmatmul.mubr.f32.gmra.mrb[8].mxu0 %v6755_v36 }
  0x95   :  { %5667 = vmatprep.mubr.f32.mxu0 %v6758_v37 }
  0x98   :  { %5668 = vmatmul.mubr.f32.gmra.mrb[10].mxu0 %v6778_v50 }
  0x99   :  { %5670 = vmatprep.mubr.f32.mxu0 %v6781_v51 }
  0x9c   :  { %5671 = vmatmul.mubr.f32.gmra.mrb[12].mxu0 %v6794_v1 }
  0x9d   :  { %5673 = vmatprep.mubr.f32.mxu0 %v6816_v53 }
  0xa0   :  { %5674 = vmatmul.mubr.f32.gmra.mrb[14].mxu0 %v6819_v54 }
  0xa1   :  { %5680 = vmatprep.mubr.f32.mxu0 %v192_v27 }
  0xa4   :  { %5681 = vmatmul.mubr.f32.vlgmr.msra.gmra.mrb[0].mxu0 %v202_v31 }
  0xa5   :  { %5683 = vmatprep.mubr.f32.mxu0 %v212_v32  ;;  %6115 = vmatpush3.bf16.msra.mxu0 %v6112_v44 }
  0xa6   :  { %6117 = vmatprep.subr.bf16.mxu0 %v6656_v14 }
  0xa8   :  { %5684 = vmatmul.mubr.f32.gmra.mrb[2].mxu0 %v222_v33 }
  0xa9   :  { %5686 = vmatprep.mubr.f32.mxu0 %v232_v42 }
  0xac   :  { %5687 = vmatmul.mubr.f32.gmra.mrb[4].mxu0 %v242_v57 }
  0xad   :  { %5689 = vmatprep.mubr.f32.mxu0 %v252_v30 }
  0xb0   :  { %5690 = vmatmul.mubr.f32.gmra.mrb[6].mxu0 %v262_v35 }
  0xb1   :  { %5692 = vmatprep.mubr.f32.mxu0 %v272_v39 }
  0xb4   :  { %5693 = vmatmul.mubr.f32.gmra.mrb[8].mxu0 %v282_v46 }
  0xb5   :  { %5695 = vmatprep.mubr.f32.mxu0 %v292_v47 }
  0xb8   :  { %5696 = vmatmul.mubr.f32.gmra.mrb[10].mxu0 %v302_v63 }
  0xb9   :  { %5698 = vmatprep.mubr.f32.mxu0 %v312_v0 }
  0xbc   :  { %5699 = vmatmul.mubr.f32.gmra.mrb[12].mxu0 %v322_v18 }
  0xbd   :  { %5701 = vmatprep.mubr.f32.mxu0 %v332_v55 }
  0xc0   :  { %5702 = vmatmul.mubr.f32.gmra.mrb[14].mxu0 %v342_v28 }
  0xc1   :  { %5708 = vmatprep.mubr.f32.mxu0 %v6651_v9 }
  0xc4   :  { %5709 = vmatmul.mubr.f32.vlgmr.msra.gmra.mrb[0].mxu0 %v6658_v15 }
  0xc5   :  { %5711 = vmatprep.mubr.f32.mxu0 %v6660_v16  ;;  %6119 = vmatpush3.bf16.msra.mxu0 %v6656_v14 }
  0xc8   :  { %5712 = vmatmul.mubr.f32.gmra.mrb[2].mxu0 %v6662_v17 }
  0xc9   :  { %5714 = vmatprep.mubr.f32.mxu0 %v6682_v26 }
  0xcc   :  { %5715 = vmatmul.mubr.f32.gmra.mrb[4].mxu0 %v6704_v38 }
  0xcd   :  { %5717 = vmatprep.mubr.f32.mxu0 %v6725_v61 }
  0xd0   :  { %5718 = vmatmul.mubr.f32.gmra.mrb[6].mxu0 %v6727_v62 }
  0xd1   :  { %5720 = vmatprep.mubr.f32.mxu0 %v6733_v3 }
  0xd4   :  { %5721 = vmatmul.mubr.f32.gmra.mrb[8].mxu0 %v6743_v8 }
  0xd5   :  { %5723 = vmatprep.mubr.f32.mxu0 %v6745_v10 }
  0xd8   :  { %5724 = vmatmul.mubr.f32.gmra.mrb[10].mxu0 %v6761_v40 }
  0xd9   :  { %5726 = vmatprep.mubr.f32.mxu0 %v6763_v41 }
  0xdc   :  { %5727 = vmatmul.mubr.f32.gmra.mrb[12].mxu0 %v6783_v52 }
  0xdd   :  { %5729 = vmatprep.mubr.f32.mxu0 %v6801_v12 }
  0xe0   :  { %5730 = vmatmul.mubr.f32.gmra.mrb[14].mxu0 %v6804_v22 }
  0xe1   :  { %5736 = vmatprep.mubr.f32.mxu0 %v6651_v9  ;;  %v1227_v9 = vld [vmem:[#allocation2] sm:$0xff] }
  0xe2   :  { %v1230_v14 = vsel %vm74_vm0, %v1227_v9, 0 }
  0xe4   :  { %5737 = vmatmul.mubr.f32.vlgmr.msra.gmra.mrb[0].mxu0 %v6658_v15  ;;  %v6933_v15 = vand.u32 4294901760, %v1230_v14 }
  0xe5   :  { %5739 = vmatprep.mubr.f32.mxu0 %v6660_v16 }
  0xe6   :  { %v6936_v16 = vsub.f32 %v1230_v14, %v6933_v15 }
  0xe8   :  { %5740 = vmatmul.mubr.f32.gmra.mrb[2].mxu0 %v6662_v17  ;;  %v6939_v17 = vand.u32 4294901760, %v6936_v16 }
  0xe9   :  { %5742 = vmatprep.mubr.f32.mxu0 %v6682_v26  ;;  %v6947_v26 = vand.u32 4294901760, %v1233_v25 }
  0xea   :  { %v1305_v19 = vsub.f32 %v6936_v16, %v6939_v17 }
  0xeb   :  { %v6950_v27 = vsub.f32 %v1233_v25, %v6947_v26 }
  0xec   :  { %5743 = vmatmul.mubr.f32.gmra.mrb[4].mxu0 %v6704_v38  ;;  %v6943_v23 = vand.u32 4294901760, %v1305_v19 }
  0xed   :  { %5745 = vmatprep.mubr.f32.mxu0 %v6725_v61  ;;  %v6953_v31 = vand.u32 4294901760, %v6950_v27 }
  0xee   :  { %5764 = vmatprep.mubr.f32.mxu1 %v6943_v23 }
  0xef   :  { %v1315_v42 = vsub.f32 %v6950_v27, %v6953_v31 }
  0xf0   :  { %5746 = vmatmul.mubr.f32.gmra.mrb[6].mxu0 %v6727_v62 }
  0xf1   :  { %5748 = vmatprep.mubr.f32.mxu0 %v6733_v3  ;;  %v6960_v13 = vand.u32 4294901760, %v1315_v42 }
  0xf4   :  { %5749 = vmatmul.mubr.f32.gmra.mrb[8].mxu0 %v6743_v8 }
  0xf5   :  { %5751 = vmatprep.mubr.f32.mxu0 %v6745_v10 }
  0xf8   :  { %5752 = vmatmul.mubr.f32.gmra.mrb[10].mxu0 %v6761_v40 }
  0xf9   :  { %5754 = vmatprep.mubr.f32.mxu0 %v6763_v41 }
  0xfc   :  { %5755 = vmatmul.mubr.f32.gmra.mrb[12].mxu0 %v6783_v52 }
  0xfd   :  { %5757 = vmatprep.mubr.f32.mxu0 %v6801_v12 }
 0x100   :  { %5758 = vmatmul.mubr.f32.gmra.mrb[14].mxu0 %v6804_v22 }
 0x1b7   :  { %v5738_v32 = vpop.f32.mrb[0].mxu0 }
 0x1b8   :  { %v1239_v33 = vand.u32 4294901760, %v5738_v32  ;;  %v1133_v34 = vpop.f32.mrb[1].mxu0 }
 0x1b9   :  { %v1236_v38 = vand.u32 4294901760, %v1133_v34 }
 0x1ba   :  { %v1331_v48 = vsub.f32 %v5738_v32, %v1239_v33 }
 0x1bb   :  { %v6957_v57 = vpack.c.bf16 %v1239_v33, %v1236_v38  ;;  %v1324_v61 = vsub.f32 %v1133_v34, %v1236_v38  ;;  %v5741_v62 = vpop.f32.mrb[2].mxu0 }
 0x1bc   :  { %v1332_v3 = vand.u32 4294901760, %v1331_v48  ;;  %v1743_v6 = vand.u32 4294901760, %v5741_v62  ;;  %v1145_v7 = vpop.f32.mrb[3].mxu0 }
 0x1bd   :  { %v1325_v8 = vand.u32 4294901760, %v1324_v61  ;;  %v1740_v10 = vand.u32 4294901760, %v1145_v7  ;;  %6121 = vmatprep.subr.bf16.mxu1 %v6957_v57  ;;  %v6128_v30 = vpack.c.bf16 %v1331_v48, %v1324_v61 }
 0x1be   :  { %v1333_v35 = vsub.f32 %v1331_v48, %v1332_v3  ;;  %v1835_v36 = vsub.f32 %v5741_v62, %v1743_v6  ;;  %6123 = vmatpush3.bf16.msra.mxu1 %v6957_v57 }
 0x1bf   :  { %v1326_v37 = vsub.f32 %v1324_v61, %v1325_v8  ;;  %v6963_v39 = vpack.c.bf16 %v1743_v6, %v1740_v10  ;;  %v1828_v40 = vsub.f32 %v1145_v7, %v1740_v10  ;;  %v5744_v41 = vpop.f32.mrb[4].mxu0  ;;  %v6965_v46 = vpack.c.bf16 %v1332_v3, %v1325_v8 }
 0x1c0   :  { %v1836_v47 = vand.u32 4294901760, %v1835_v36  ;;  %v2248_v50 = vand.u32 4294901760, %v5744_v41  ;;  %v1157_v51 = vpop.f32.mrb[5].mxu0  ;;  %v1334_v52 = vand.u32 4294901760, %v1333_v35 }
 0x1c1   :  { %v1829_v63 = vand.u32 4294901760, %v1828_v40  ;;  %v2245_v0 = vand.u32 4294901760, %v1157_v51  ;;  %5765 = vmatmul.mubr.f32.vlgmr.msra.gmra.mrb[0].mxu1 %v6960_v13  ;;  %v1327_v1 = vand.u32 4294901760, %v1326_v37  ;;  %v6968_v4 = vpack.c.bf16 %v1835_v36, %v1828_v40 }
 0x1c2   :  { %v1837_v5 = vsub.f32 %v1835_v36, %v1836_v47  ;;  %v2340_v11 = vsub.f32 %v5744_v41, %v2248_v50  ;;  %5771 = vmatprep.mubr.f32.mxu1 %v6933_v15 }
 0x1c3   :  { %v1830_v12 = vsub.f32 %v1828_v40, %v1829_v63  ;;  %v6971_v18 = vpack.c.bf16 %v2248_v50, %v2245_v0  ;;  %v2333_v22 = vsub.f32 %v1157_v51, %v2245_v0  ;;  %v5747_v43 = vpop.f32.mrb[6].mxu0  ;;  %v6124_v44 = vpack.c.bf16 %v1334_v52, %v1327_v1 }
 0x1c4   :  { %v2341_v45 = vand.u32 4294901760, %v2340_v11  ;;  %v2753_v49 = vand.u32 4294901760, %v5747_v43  ;;  %v1169_v53 = vpop.f32.mrb[7].mxu0  ;;  %v1838_v54 = vand.u32 4294901760, %v1837_v5  ;;  %v6973_v55 = vpack.c.bf16 %v1836_v47, %v1829_v63 }
 0x1c5   :  { %v2334_v20 = vand.u32 4294901760, %v2333_v22  ;;  %v2750_v21 = vand.u32 4294901760, %v1169_v53  ;;  %6125 = vmatprep.subr.bf16.mxu1 %v6124_v44  ;;  %v1831_v28 = vand.u32 4294901760, %v1830_v12  ;;  %v6975_v29 = vpack.c.bf16 %v2340_v11, %v2333_v22 }
 0x1c6   :  { %v2342_v56 = vsub.f32 %v2340_v11, %v2341_v45  ;;  %v2845_v58 = vsub.f32 %v5747_v43, %v2753_v49  ;;  %6127 = vmatpush3.bf16.msra.mxu1 %v6124_v44 }
 0x1c7   :  { %v2335_v59 = vsub.f32 %v2333_v22, %v2334_v20  ;;  %v6977_v60 = vpack.c.bf16 %v2753_v49, %v2750_v21  ;;  %v2838_v2 = vsub.f32 %v1169_v53, %v2750_v21  ;;  %v5750_v9 = vpop.f32.mrb[8].mxu0  ;;  %6129 = vmatprep.subr.bf16.mxu1 %v6128_v30  ;;  %v6979_v14 = vpack.c.bf16 %v1838_v54, %v1831_v28 }
 0x1c8   :  { %v2846_v19 = vand.u32 4294901760, %v2845_v58  ;;  %v3258_v24 = vand.u32 4294901760, %v5750_v9  ;;  %v1181_v25 = vpop.f32.mrb[9].mxu0  ;;  %v2343_v32 = vand.u32 4294901760, %v2342_v56  ;;  %v6981_v33 = vpack.c.bf16 %v2341_v45, %v2334_v20 }
 0x1c9   :  { %v2839_v34 = vand.u32 4294901760, %v2838_v2  ;;  %v3255_v38 = vand.u32 4294901760, %v1181_v25  ;;  %5772 = vmatmul.mubr.f32.vlgmr.msra.gmra.mrb[0].mxu1 %v6947_v26  ;;  %v2336_v42 = vand.u32 4294901760, %v2335_v59  ;;  %v6984_v48 = vpack.c.bf16 %v2845_v58, %v2838_v2 }
 0x1ca   :  { %v2847_v61 = vsub.f32 %v2845_v58, %v2846_v19  ;;  %v3350_v62 = vsub.f32 %v5750_v9, %v3258_v24  ;;  %6131 = vmatpush3.bf16.msra.mxu1 %v6128_v30  ;;  %5778 = vmatprep.mubr.f32.mxu1 %v6936_v16 }
 0x1cb   :  { %v2840_v3 = vsub.f32 %v2838_v2, %v2839_v34  ;;  %v6987_v6 = vpack.c.bf16 %v3258_v24, %v3255_v38  ;;  %v3343_v7 = vsub.f32 %v1181_v25, %v3255_v38  ;;  %v5753_v8 = vpop.f32.mrb[10].mxu0  ;;  %6133 = vmatprep.subr.bf16.mxu1 %v6957_v57  ;;  %v6990_v10 = vpack.c.bf16 %v2343_v32, %v2336_v42 }
 0x1cc   :  { %v3351_v35 = vand.u32 4294901760, %v3350_v62  ;;  %v3763_v36 = vand.u32 4294901760, %v5753_v8  ;;  %v1193_v37 = vpop.f32.mrb[11].mxu0  ;;  %v2848_v40 = vand.u32 4294901760, %v2847_v61  ;;  %v6992_v41 = vpack.c.bf16 %v2846_v19, %v2839_v34 }
 0x1cd   :  { %v3344_v47 = vand.u32 4294901760, %v3343_v7  ;;  %v3760_v50 = vand.u32 4294901760, %v1193_v37  ;;  %v2841_v30 = vand.u32 4294901760, %v2840_v3  ;;  %v6994_v51 = vpack.c.bf16 %v3350_v62, %v3343_v7 }
 0x1ce   :  { %v3352_v52 = vsub.f32 %v3350_v62, %v3351_v35  ;;  %v3855_v63 = vsub.f32 %v5753_v8, %v3763_v36 }
 0x1cf   :  { %v3345_v0 = vsub.f32 %v3343_v7, %v3344_v47  ;;  %v6996_v1 = vpack.c.bf16 %v3763_v36, %v3760_v50  ;;  %v3848_v5 = vsub.f32 %v1193_v37, %v3760_v50  ;;  %v5756_v11 = vpop.f32.mrb[12].mxu0  ;;  %v6998_v12 = vpack.c.bf16 %v2848_v40, %v2841_v30 }
 0x1d0   :  { %v3856_v22 = vand.u32 4294901760, %v3855_v63  ;;  %v4268_v43 = vand.u32 4294901760, %v5756_v11  ;;  %v1205_v44 = vpop.f32.mrb[13].mxu0  ;;  %v3353_v45 = vand.u32 4294901760, %v3352_v52  ;;  %v7000_v49 = vpack.c.bf16 %v3351_v35, %v3344_v47 }
 0x1d1   :  { %v3849_v53 = vand.u32 4294901760, %v3848_v5  ;;  %v4265_v54 = vand.u32 4294901760, %v1205_v44  ;;  %5779 = vmatmul.mubr.f32.vlgmr.msra.gmra.mrb[0].mxu1 %v6950_v27  ;;  %v3346_v20 = vand.u32 4294901760, %v3345_v0  ;;  %v7003_v21 = vpack.c.bf16 %v3855_v63, %v3848_v5 }
 0x1d2   :  { %v3857_v28 = vsub.f32 %v3855_v63, %v3856_v22  ;;  %v4360_v56 = vsub.f32 %v5756_v11, %v4268_v43  ;;  %6135 = vmatpush3.bf16.msra.mxu1 %v6957_v57  ;;  %5785 = vmatprep.mubr.f32.mxu1 %v6939_v17 }
 0x1d3   :  { %v3850_v58 = vsub.f32 %v3848_v5, %v3849_v53  ;;  %v7007_v59 = vpack.c.bf16 %v4268_v43, %v4265_v54  ;;  %v4353_v2 = vsub.f32 %v1205_v44, %v4265_v54  ;;  %6137 = vmatprep.subr.bf16.mxu1 %v6965_v46  ;;  %v5759_v9 = vpop.f32.mrb[14].mxu0  ;;  %v7010_v19 = vpack.c.bf16 %v3353_v45, %v3346_v20 }
 0x1d4   :  { %v4361_v24 = vand.u32 4294901760, %v4360_v56  ;;  %v4773_v25 = vand.u32 4294901760, %v5759_v9  ;;  %v1217_v32 = vpop.f32.mrb[15].mxu0  ;;  %v3858_v34 = vand.u32 4294901760, %v3857_v28  ;;  %v7012_v38 = vpack.c.bf16 %v3856_v22, %v3849_v53 }
 0x1d5   :  { %v4354_v42 = vand.u32 4294901760, %v4353_v2  ;;  %v4770_v61 = vand.u32 4294901760, %v1217_v32  ;;  %v3851_v62 = vand.u32 4294901760, %v3850_v58  ;;  %v7014_v3 = vpack.c.bf16 %v4360_v56, %v4353_v2 }
 0x1d6   :  { %v4362_v7 = vsub.f32 %v4360_v56, %v4361_v24  ;;  %v4865_v8 = vsub.f32 %v5759_v9, %v4773_v25 }
 0x1d7   :  { %v4355_v35 = vsub.f32 %v4353_v2, %v4354_v42  ;;  %v7016_v36 = vpack.c.bf16 %v4773_v25, %v4770_v61  ;;  %v4858_v37 = vsub.f32 %v1217_v32, %v4770_v61  ;;  %v7018_v40 = vpack.c.bf16 %v3858_v34, %v3851_v62 }
 0x1d8   :  { %v4866_v47 = vand.u32 4294901760, %v4865_v8  ;;  %v4363_v50 = vand.u32 4294901760, %v4362_v7  ;;  %v7020_v30 = vpack.c.bf16 %v4361_v24, %v4354_v42 }
 0x1d9   :  { %v4859_v52 = vand.u32 4294901760, %v4858_v37  ;;  %5786 = vmatmul.mubr.f32.vlgmr.msra.gmra.mrb[0].mxu1 %v6953_v31  ;;  %v4356_v63 = vand.u32 4294901760, %v4355_v35  ;;  %v7023_v0 = vpack.c.bf16 %v4865_v8, %v4858_v37 }
 0x1da   :  { %v4867_v5 = vsub.f32 %v4865_v8, %v4866_v47  ;;  %6139 = vmatpush3.bf16.msra.mxu1 %v6965_v46  ;;  %5792 = vmatprep.mubr.f32.mxu1 %v6933_v15 }
 0x1db   :  { %v4860_v11 = vsub.f32 %v4858_v37, %v4859_v52  ;;  %6141 = vmatprep.subr.bf16.mxu1 %v6957_v57  ;;  %v7028_v22 = vpack.c.bf16 %v4363_v50, %v4356_v63  ;;  %v7030_v43 = vpack.c.bf16 %v4866_v47, %v4859_v52 }
 0x1dc   :  { %v4868_v44 = vand.u32 4294901760, %v4867_v5 }
 0x1dd   :  { %v4861_v45 = vand.u32 4294901760, %v4860_v11 }
 0x1df   :  { %v7032_v53 = vpack.c.bf16 %v4868_v44, %v4861_v45 }
 0x1e1   :  { %5793 = vmatmul.mubr.f32.vlgmr.msra.gmra.mrb[0].mxu1 %v6947_v26 }
 0x1e2   :  { %6143 = vmatpush3.bf16.msra.mxu1 %v6957_v57  ;;  %5799 = vmatprep.mubr.f32.mxu1 %v6933_v15 }
 0x1e3   :  { %6145 = vmatprep.subr.bf16.mxu1 %v6963_v39 }
 0x1e9   :  { %5800 = vmatmul.mubr.f32.vlgmr.msra.gmra.mrb[0].mxu1 %v6947_v26 }
 0x1ea   :  { %6147 = vmatpush3.bf16.msra.mxu1 %v6963_v39  ;;  %5806 = vmatprep.mubr.f32.mxu1 %v6943_v23 }
 0x1eb   :  { %6149 = vmatprep.subr.bf16.mxu1 %v6979_v14 }
 0x1ed   :  { %5807 = vmatmul.mubr.f32.vlgmr.msra.gmra.mrb[2].mxu1 %v6960_v13 }
 0x1ee   :  { %6151 = vmatpush3.bf16.msra.mxu1 %v6979_v14  ;;  %5813 = vmatprep.mubr.f32.mxu1 %v6933_v15 }
 0x1ef   :  { %6153 = vmatprep.subr.bf16.mxu1 %v6968_v4 }
 0x1f5   :  { %5814 = vmatmul.mubr.f32.vlgmr.msra.gmra.mrb[2].mxu1 %v6947_v26 }
 0x1f6   :  { %6155 = vmatpush3.bf16.msra.mxu1 %v6968_v4  ;;  %5820 = vmatprep.mubr.f32.mxu1 %v6936_v16 }
 0x1f7   :  { %6157 = vmatprep.subr.bf16.mxu1 %v6963_v39 }
 0x1fd   :  { %5821 = vmatmul.mubr.f32.vlgmr.msra.gmra.mrb[2].mxu1 %v6950_v27 }
 0x1fe   :  { %6159 = vmatpush3.bf16.msra.mxu1 %v6963_v39  ;;  %5827 = vmatprep.mubr.f32.mxu1 %v6939_v17 }
 0x1ff   :  { %6161 = vmatprep.subr.bf16.mxu1 %v6973_v55 }
 0x205   :  { %5828 = vmatmul.mubr.f32.vlgmr.msra.gmra.mrb[2].mxu1 %v6953_v31 }
 0x206   :  { %6163 = vmatpush3.bf16.msra.mxu1 %v6973_v55  ;;  %5834 = vmatprep.mubr.f32.mxu1 %v6933_v15 }
 0x207   :  { %6165 = vmatprep.subr.bf16.mxu1 %v6963_v39 }
 0x20d   :  { %5835 = vmatmul.mubr.f32.vlgmr.msra.gmra.mrb[2].mxu1 %v6947_v26 }
 0x20e   :  { %6167 = vmatpush3.bf16.msra.mxu1 %v6963_v39  ;;  %5841 = vmatprep.mubr.f32.mxu1 %v6933_v15 }
 0x20f   :  { %6169 = vmatprep.subr.bf16.mxu1 %v6971_v18 }
 0x215   :  { %5842 = vmatmul.mubr.f32.vlgmr.msra.gmra.mrb[2].mxu1 %v6947_v26 }
 0x216   :  { %6171 = vmatpush3.bf16.msra.mxu1 %v6971_v18  ;;  %5848 = vmatprep.mubr.f32.mxu1 %v6943_v23 }
 0x217   :  { %6173 = vmatprep.subr.bf16.mxu1 %v6990_v10 }
 0x219   :  { %5849 = vmatmul.mubr.f32.vlgmr.msra.gmra.mrb[4].mxu1 %v6960_v13 }
 0x21a   :  { %6175 = vmatpush3.bf16.msra.mxu1 %v6990_v10  ;;  %5855 = vmatprep.mubr.f32.mxu1 %v6933_v15 }
 0x21b   :  { %6177 = vmatprep.subr.bf16.mxu1 %v6975_v29 }
 0x221   :  { %5856 = vmatmul.mubr.f32.vlgmr.msra.gmra.mrb[4].mxu1 %v6947_v26 }
 0x222   :  { %6179 = vmatpush3.bf16.msra.mxu1 %v6975_v29  ;;  %5862 = vmatprep.mubr.f32.mxu1 %v6936_v16 }
 0x223   :  { %6181 = vmatprep.subr.bf16.mxu1 %v6971_v18 }
 0x229   :  { %5863 = vmatmul.mubr.f32.vlgmr.msra.gmra.mrb[4].mxu1 %v6950_v27 }
 0x22a   :  { %6183 = vmatpush3.bf16.msra.mxu1 %v6971_v18  ;;  %5869 = vmatprep.mubr.f32.mxu1 %v6939_v17 }
 0x22b   :  { %6185 = vmatprep.subr.bf16.mxu1 %v6981_v33 }
 0x231   :  { %5870 = vmatmul.mubr.f32.vlgmr.msra.gmra.mrb[4].mxu1 %v6953_v31 }
 0x232   :  { %6187 = vmatpush3.bf16.msra.mxu1 %v6981_v33  ;;  %5876 = vmatprep.mubr.f32.mxu1 %v6933_v15 }
 0x233   :  { %6189 = vmatprep.subr.bf16.mxu1 %v6971_v18 }
 0x239   :  { %5877 = vmatmul.mubr.f32.vlgmr.msra.gmra.mrb[4].mxu1 %v6947_v26 }
 0x23a   :  { %6191 = vmatpush3.bf16.msra.mxu1 %v6971_v18  ;;  %5883 = vmatprep.mubr.f32.mxu1 %v6933_v15 }
 0x23b   :  { %6193 = vmatprep.subr.bf16.mxu1 %v6977_v60 }
 0x241   :  { %5884 = vmatmul.mubr.f32.vlgmr.msra.gmra.mrb[4].mxu1 %v6947_v26 }
 0x242   :  { %6195 = vmatpush3.bf16.msra.mxu1 %v6977_v60  ;;  %5890 = vmatprep.mubr.f32.mxu1 %v6943_v23 }
 0x243   :  { %6197 = vmatprep.subr.bf16.mxu1 %v6998_v12 }
 0x245   :  { %5891 = vmatmul.mubr.f32.vlgmr.msra.gmra.mrb[6].mxu1 %v6960_v13 }
 0x246   :  { %6199 = vmatpush3.bf16.msra.mxu1 %v6998_v12  ;;  %5897 = vmatprep.mubr.f32.mxu1 %v6933_v15 }
 0x247   :  { %6201 = vmatprep.subr.bf16.mxu1 %v6984_v48 }
 0x24d   :  { %5898 = vmatmul.mubr.f32.vlgmr.msra.gmra.mrb[6].mxu1 %v6947_v26 }
 0x24e   :  { %6203 = vmatpush3.bf16.msra.mxu1 %v6984_v48  ;;  %5904 = vmatprep.mubr.f32.mxu1 %v6936_v16 }
 0x24f   :  { %6205 = vmatprep.subr.bf16.mxu1 %v6977_v60 }
 0x255   :  { %5905 = vmatmul.mubr.f32.vlgmr.msra.gmra.mrb[6].mxu1 %v6950_v27 }
 0x256   :  { %6207 = vmatpush3.bf16.msra.mxu1 %v6977_v60  ;;  %5911 = vmatprep.mubr.f32.mxu1 %v6939_v17 }
 0x257   :  { %6209 = vmatprep.subr.bf16.mxu1 %v6992_v41 }
 0x25d   :  { %5912 = vmatmul.mubr.f32.vlgmr.msra.gmra.mrb[6].mxu1 %v6953_v31 }
 0x25e   :  { %6211 = vmatpush3.bf16.msra.mxu1 %v6992_v41  ;;  %5918 = vmatprep.mubr.f32.mxu1 %v6933_v15 }
 0x25f   :  { %6213 = vmatprep.subr.bf16.mxu1 %v6977_v60 }
 0x265   :  { %5919 = vmatmul.mubr.f32.vlgmr.msra.gmra.mrb[6].mxu1 %v6947_v26 }
 0x266   :  { %6215 = vmatpush3.bf16.msra.mxu1 %v6977_v60  ;;  %5925 = vmatprep.mubr.f32.mxu1 %v6933_v15 }
 0x267   :  { %6217 = vmatprep.subr.bf16.mxu1 %v6987_v6 }
 0x26d   :  { %5926 = vmatmul.mubr.f32.vlgmr.msra.gmra.mrb[6].mxu1 %v6947_v26 }
 0x26e   :  { %6219 = vmatpush3.bf16.msra.mxu1 %v6987_v6  ;;  %5932 = vmatprep.mubr.f32.mxu1 %v6943_v23 }
 0x26f   :  { %6221 = vmatprep.subr.bf16.mxu1 %v7010_v19 }
 0x271   :  { %5933 = vmatmul.mubr.f32.vlgmr.msra.gmra.mrb[8].mxu1 %v6960_v13 }
 0x272   :  { %6223 = vmatpush3.bf16.msra.mxu1 %v7010_v19  ;;  %5939 = vmatprep.mubr.f32.mxu1 %v6933_v15 }
 0x273   :  { %6225 = vmatprep.subr.bf16.mxu1 %v6994_v51 }
 0x279   :  { %5940 = vmatmul.mubr.f32.vlgmr.msra.gmra.mrb[8].mxu1 %v6947_v26 }
 0x27a   :  { %6227 = vmatpush3.bf16.msra.mxu1 %v6994_v51  ;;  %5946 = vmatprep.mubr.f32.mxu1 %v6936_v16 }
 0x27b   :  { %6229 = vmatprep.subr.bf16.mxu1 %v6987_v6 }
 0x281   :  { %5947 = vmatmul.mubr.f32.vlgmr.msra.gmra.mrb[8].mxu1 %v6950_v27 }
 0x282   :  { %6231 = vmatpush3.bf16.msra.mxu1 %v6987_v6  ;;  %5953 = vmatprep.mubr.f32.mxu1 %v6939_v17 }
 0x283   :  { %6233 = vmatprep.subr.bf16.mxu1 %v7000_v49 }
 0x289   :  { %5954 = vmatmul.mubr.f32.vlgmr.msra.gmra.mrb[8].mxu1 %v6953_v31 }
 0x28a   :  { %6235 = vmatpush3.bf16.msra.mxu1 %v7000_v49  ;;  %5960 = vmatprep.mubr.f32.mxu1 %v6933_v15 }
 0x28b   :  { %6237 = vmatprep.subr.bf16.mxu1 %v6987_v6 }
 0x291   :  { %5961 = vmatmul.mubr.f32.vlgmr.msra.gmra.mrb[8].mxu1 %v6947_v26 }
 0x292   :  { %6239 = vmatpush3.bf16.msra.mxu1 %v6987_v6  ;;  %5967 = vmatprep.mubr.f32.mxu1 %v6933_v15 }
 0x293   :  { %6241 = vmatprep.subr.bf16.mxu1 %v6996_v1 }
 0x299   :  { %5968 = vmatmul.mubr.f32.vlgmr.msra.gmra.mrb[8].mxu1 %v6947_v26 }
 0x29a   :  { %6243 = vmatpush3.bf16.msra.mxu1 %v6996_v1  ;;  %5974 = vmatprep.mubr.f32.mxu1 %v6943_v23 }
 0x29b   :  { %6245 = vmatprep.subr.bf16.mxu1 %v7018_v40 }
 0x29d   :  { %5975 = vmatmul.mubr.f32.vlgmr.msra.gmra.mrb[10].mxu1 %v6960_v13 }
 0x29e   :  { %6247 = vmatpush3.bf16.msra.mxu1 %v7018_v40  ;;  %5981 = vmatprep.mubr.f32.mxu1 %v6933_v15 }
 0x29f   :  { %6249 = vmatprep.subr.bf16.mxu1 %v7003_v21 }
 0x2a5   :  { %5982 = vmatmul.mubr.f32.vlgmr.msra.gmra.mrb[10].mxu1 %v6947_v26 }
 0x2a6   :  { %6251 = vmatpush3.bf16.msra.mxu1 %v7003_v21  ;;  %5988 = vmatprep.mubr.f32.mxu1 %v6936_v16 }
 0x2a7   :  { %6253 = vmatprep.subr.bf16.mxu1 %v6996_v1 }
 0x2ad   :  { %5989 = vmatmul.mubr.f32.vlgmr.msra.gmra.mrb[10].mxu1 %v6950_v27 }
 0x2ae   :  { %6255 = vmatpush3.bf16.msra.mxu1 %v6996_v1  ;;  %5995 = vmatprep.mubr.f32.mxu1 %v6939_v17 }
 0x2af   :  { %6257 = vmatprep.subr.bf16.mxu1 %v7012_v38 }
 0x2b5   :  { %5996 = vmatmul.mubr.f32.vlgmr.msra.gmra.mrb[10].mxu1 %v6953_v31 }
 0x2b6   :  { %6259 = vmatpush3.bf16.msra.mxu1 %v7012_v38  ;;  %6002 = vmatprep.mubr.f32.mxu1 %v6933_v15 }
 0x2b7   :  { %6261 = vmatprep.subr.bf16.mxu1 %v6996_v1 }
 0x2bc   :  { %v5801_v57 = vpop.f32.mrb[0].mxu1 }
 0x2bd   :  { %1738 = vst.msk [vmem:[#allocation8 + $0x8] sm:$0xff] %vm74_vm0, %v5801_v57  ;;  %v1727_v39 = vpop.f32.mrb[1].mxu1  ;;  %6003 = vmatmul.mubr.f32.vlgmr.msra.gmra.mrb[10].mxu1 %v6947_v26 }
 0x2be   :  { %1737 = vst.msk [vmem:[#allocation8] sm:$0xff] %vm74_vm0, %v1727_v39  ;;  %6263 = vmatpush3.bf16.msra.mxu1 %v6996_v1  ;;  %6009 = vmatprep.mubr.f32.mxu1 %v6933_v15 }
 0x2bf   :  { %6265 = vmatprep.subr.bf16.mxu1 %v7007_v59 }
 0x2c5   :  { %6010 = vmatmul.mubr.f32.vlgmr.msra.gmra.mrb[10].mxu1 %v6947_v26 }
 0x2c6   :  { %6267 = vmatpush3.bf16.msra.mxu1 %v7007_v59  ;;  %6016 = vmatprep.mubr.f32.mxu1 %v6943_v23 }
 0x2c7   :  { %6269 = vmatprep.subr.bf16.mxu1 %v7028_v22 }
 0x2c9   :  { %6017 = vmatmul.mubr.f32.vlgmr.msra.gmra.mrb[12].mxu1 %v6960_v13 }
 0x2ca   :  { %6271 = vmatpush3.bf16.msra.mxu1 %v7028_v22  ;;  %6023 = vmatprep.mubr.f32.mxu1 %v6933_v15 }
 0x2cb   :  { %6273 = vmatprep.subr.bf16.mxu1 %v7014_v3 }
 0x2d1   :  { %6024 = vmatmul.mubr.f32.vlgmr.msra.gmra.mrb[12].mxu1 %v6947_v26 }
 0x2d2   :  { %6275 = vmatpush3.bf16.msra.mxu1 %v7014_v3  ;;  %6030 = vmatprep.mubr.f32.mxu1 %v6936_v16 }
 0x2d3   :  { %6277 = vmatprep.subr.bf16.mxu1 %v7007_v59 }
 0x2d9   :  { %6031 = vmatmul.mubr.f32.vlgmr.msra.gmra.mrb[12].mxu1 %v6950_v27 }
 0x2da   :  { %6279 = vmatpush3.bf16.msra.mxu1 %v7007_v59  ;;  %6037 = vmatprep.mubr.f32.mxu1 %v6939_v17 }
 0x2db   :  { %6281 = vmatprep.subr.bf16.mxu1 %v7020_v30 }
 0x2e1   :  { %6038 = vmatmul.mubr.f32.vlgmr.msra.gmra.mrb[12].mxu1 %v6953_v31 }
 0x2e2   :  { %6283 = vmatpush3.bf16.msra.mxu1 %v7020_v30  ;;  %6044 = vmatprep.mubr.f32.mxu1 %v6933_v15 }
 0x2e3   :  { %6285 = vmatprep.subr.bf16.mxu1 %v7007_v59 }
 0x2e8   :  { %v5843_v46 = vpop.f32.mrb[2].mxu1 }
 0x2e9   :  { %2243 = vst.msk [vmem:[#allocation8 + $0x18] sm:$0xff] %vm74_vm0, %v5843_v46  ;;  %v2231_v4 = vpop.f32.mrb[3].mxu1  ;;  %6045 = vmatmul.mubr.f32.vlgmr.msra.gmra.mrb[12].mxu1 %v6947_v26 }
 0x2ea   :  { %2242 = vst.msk [vmem:[#allocation8 + $0x10] sm:$0xff] %vm74_vm0, %v2231_v4  ;;  %6287 = vmatpush3.bf16.msra.mxu1 %v7007_v59  ;;  %6051 = vmatprep.mubr.f32.mxu1 %v6933_v15 }
 0x2eb   :  { %6289 = vmatprep.subr.bf16.mxu1 %v7016_v36 }
 0x2f1   :  { %6052 = vmatmul.mubr.f32.vlgmr.msra.gmra.mrb[12].mxu1 %v6947_v26 }
 0x2f2   :  { %6291 = vmatpush3.bf16.msra.mxu1 %v7016_v36  ;;  %6058 = vmatprep.mubr.f32.mxu1 %v6943_v23 }
 0x2f3   :  { %6293 = vmatprep.subr.bf16.mxu1 %v7032_v53 }
 0x2f5   :  { %6059 = vmatmul.mubr.f32.vlgmr.msra.gmra.mrb[14].mxu1 %v6960_v13 }
 0x2f6   :  { %6295 = vmatpush3.bf16.msra.mxu1 %v7032_v53  ;;  %6065 = vmatprep.mubr.f32.mxu1 %v6933_v15 }
 0x2f7   :  { %6297 = vmatprep.subr.bf16.mxu1 %v7023_v0 }
 0x2fd   :  { %6066 = vmatmul.mubr.f32.vlgmr.msra.gmra.mrb[14].mxu1 %v6947_v26 }
 0x2fe   :  { %6299 = vmatpush3.bf16.msra.mxu1 %v7023_v0  ;;  %6072 = vmatprep.mubr.f32.mxu1 %v6936_v16 }
 0x2ff   :  { %6301 = vmatprep.subr.bf16.mxu1 %v7016_v36 }
 0x305   :  { %6073 = vmatmul.mubr.f32.vlgmr.msra.gmra.mrb[14].mxu1 %v6950_v27 }
 0x306   :  { %6303 = vmatpush3.bf16.msra.mxu1 %v7016_v36  ;;  %6079 = vmatprep.mubr.f32.mxu1 %v6939_v17 }
 0x307   :  { %6305 = vmatprep.subr.bf16.mxu1 %v7030_v43 }
 0x30d   :  { %6080 = vmatmul.mubr.f32.vlgmr.msra.gmra.mrb[14].mxu1 %v6953_v31 }
 0x30e   :  { %6307 = vmatpush3.bf16.msra.mxu1 %v7030_v43  ;;  %6086 = vmatprep.mubr.f32.mxu1 %v6933_v15 }
 0x30f   :  { %6309 = vmatprep.subr.bf16.mxu1 %v7016_v36 }
 0x314   :  { %v5885_v23 = vpop.f32.mrb[4].mxu1 }
 0x315   :  { %2748 = vst.msk [vmem:[#allocation8 + $0x28] sm:$0xff] %vm74_vm0, %v5885_v23  ;;  %v2736_v16 = vpop.f32.mrb[5].mxu1  ;;  %6087 = vmatmul.mubr.f32.vlgmr.msra.gmra.mrb[14].mxu1 %v6947_v26 }
 0x316   :  { %2747 = vst.msk [vmem:[#allocation8 + $0x20] sm:$0xff] %vm74_vm0, %v2736_v16  ;;  %6311 = vmatpush3.bf16.msra.mxu1 %v7016_v36  ;;  %6093 = vmatprep.mubr.f32.mxu1 %v6933_v15 }
 0x31d   :  { %6094 = vmatmul.mubr.f32.vlgmr.msra.gmra.mrb[14].mxu1 %v6947_v26 }
 0x340   :  { %v5927_v17 = vpop.f32.mrb[6].mxu1 }
 0x341   :  { %3253 = vst.msk [vmem:[#allocation8 + $0x38] sm:$0xff] %vm74_vm0, %v5927_v17  ;;  %v3241_v27 = vpop.f32.mrb[7].mxu1 }
 0x342   :  { %3252 = vst.msk [vmem:[#allocation8 + $0x30] sm:$0xff] %vm74_vm0, %v3241_v27 }
 0x36c   :  { %v5969_v31 = vpop.f32.mrb[8].mxu1 }
 0x36d   :  { %3758 = vst.msk [vmem:[#allocation8 + $0x48] sm:$0xff] %vm74_vm0, %v5969_v31  ;;  %v3746_v13 = vpop.f32.mrb[9].mxu1 }
 0x36e   :  { %3757 = vst.msk [vmem:[#allocation8 + $0x40] sm:$0xff] %vm74_vm0, %v3746_v13 }
 0x398   :  { %v6011_v18 = vpop.f32.mrb[10].mxu1 }
 0x399   :  { %4263 = vst.msk [vmem:[#allocation8 + $0x58] sm:$0xff] %vm74_vm0, %v6011_v18  ;;  %v4251_v55 = vpop.f32.mrb[11].mxu1 }
 0x39a   :  { %4262 = vst.msk [vmem:[#allocation8 + $0x50] sm:$0xff] %vm74_vm0, %v4251_v55 }
 0x3c4   :  { %v6053_v15 = vpop.f32.mrb[12].mxu1 }
 0x3c5   :  { %4768 = vst.msk [vmem:[#allocation8 + $0x68] sm:$0xff] %vm74_vm0, %v6053_v15  ;;  %v4756_v26 = vpop.f32.mrb[13].mxu1 }
 0x3c6   :  { %4767 = vst.msk [vmem:[#allocation8 + $0x60] sm:$0xff] %vm74_vm0, %v4756_v26 }
 0x3f0   :  { %v6095_v29 = vpop.f32.mrb[14].mxu1 }
 0x3f1   :  { %5273 = vst.msk [vmem:[#allocation8 + $0x78] sm:$0xff] %vm74_vm0, %v6095_v29  ;;  %v5261_v60 = vpop.f32.mrb[15].mxu1 }
 0x3f2   :  { %5272 = vst.msk [vmem:[#allocation8 + $0x70] sm:$0xff] %vm74_vm0, %v5261_v60 }
 0x3f3   :  { %6555 = shalt.err (!%p6552_p0)
}
 0x3f4   :  { %s6556_s27 = scalar_lea.hbm %s7240_s3, 2048 }
 0x3f5   :  { %p6557_p1 = scmp.ne.s32.totalorder %s7240_s3, %s6556_s27  ;;  %p6560_p2 = scmp.lt.u32.totalorder %s6556_s27, %s7240_s3 }
 0x3f7   :  { %p6562_p3 = pnand %p6560_p2, %p6557_p1 }
 0x3f9   :  { %6565 = shalt.err (!%p6562_p3)
}
 0x3fa   :  { %5285 = dma.vmem_to_hbm [thread:$0]  %s5280_s21, 2048, %s7240_s3, [#allocation4], %s6574_s24, %s6574_s24, %s6575_s25  }
 0x3fb   :  { %6570 = dma.done.wait [#allocation4], 2048  }
 0x3fc   :  { %6571 = vsyncadd [#allocation4], 4294965248 }
 0x3fd   :  { %5289 = vsyncpa [#allocation3], 1 }
 0x3fe   :  { %5290 = vsyncpa [#allocation6], 1 }
 0x3ff   :  { %5291 = vsyncpa [#allocation4], 1 }

</bundles_post_ra>
